<compile_context>
chip_gen: v7x
topology: tpu7x:2x2x1
jax: 0.10.0
libtpu: 0.0.40
codegen_flags: <defaults>
</compile_context>

<pallas_src>
import functools

import jax
import jax.numpy as jnp
from jax.experimental import pallas as pl
from jax.experimental.pallas import tpu as pltpu


def _round_up(x: int, m: int) -> int:
    return (x + m - 1) // m * m


def _pick_tile_n(n: int, c: int, w_pad: int, in_itemsize: int,
                 budget_bytes: int = 20 * 1024 * 1024) -> int:
    """Largest batch tile whose VMEM footprint fits the budget.

    Budget targets the smallest machine (v7x: 64 MiB physical VMEM, 32 MiB
    scoped, which we request via vmem_limit_bytes) with headroom for Mosaic
    internals; v5e/v6e simply get the same (safe) tile.
    """
    per_row = (2 * c * w_pad * in_itemsize   # double-buffered input rows
               + 2 * w_pad * 4               # double-buffered output row
               + 4 * w_pad * 4)              # live f32 slabs (x_c, tap, acc, exp)
    cap = max(1, budget_bytes // per_row)
    if n <= cap:
        return n                             # whole batch in one block
    start = min(cap, n)
    for t in range(start - start % 8, 7, -8):  # multiple of 8 that divides n
        if n % t == 0:
            return t
    return n                                 # rare/pathological shapes: one block


def _attn_weights_kernel(x_ref, w_ref, b_ref, o_ref, *, w3, c_in, l_out, log):
    """Conv1d(out_channels=1) + masked (log_)softmax for one batch tile.

    x_ref: (tile_n * c_in, W) VMEM, native dtype; row n*c_in + c holds channel c
                              of batch row n; W = round_up(L, 128), zero padded.
    w_ref: (c_in, w3)         SMEM f32 conv weights (read as scalars).
    b_ref: (1, 1)             SMEM f32 conv bias.
    o_ref: (tile_n, W)        VMEM f32 result; columns >= l_out are padding.
    """
    tile_n, w_pad = o_ref.shape

    # Conv accumulation: per-(channel, tap) scalar * slab FMAs on dense
    # (tile_n, W) lane slabs (batch on sublanes).  The strided sublane read
    # pulls channel `ci` of every batch row of the tile; pltpu.roll realizes
    # tap k on the XLU so no shifted lane-slice copies are materialized.
    acc = jnp.zeros((tile_n, w_pad), jnp.float32)
    for ci in range(c_in):
        x_c = x_ref[pl.ds(ci, tile_n, stride=c_in), :].astype(jnp.float32)
        for k in range(w3):
            # roll left by k: tap[t] = x_c[t + k] for all valid t < l_out;
            # wrapped / zero-padded lanes only land in masked columns.
            tap = x_c if k == 0 else pltpu.roll(x_c, w_pad - k, 1)
            acc = acc + tap * w_ref[ci, k]
    acc = acc + b_ref[0, 0]   # shift-invariant under (log_)softmax; kept for clarity

    # Numerically-stable (log_)softmax over the sequence axis with padded lanes
    # masked out, so valid lanes still sum to 1.
    col = jax.lax.broadcasted_iota(jnp.int32, (tile_n, w_pad), 1)
    logits = jnp.where(col < l_out, acc, -jnp.inf)
    m = jnp.max(logits, axis=1, keepdims=True)
    e = jnp.exp(logits - m)                       # padded lanes -> exp(-inf) = 0
    denom = jnp.sum(e, axis=1, keepdims=True)
    if log:
        o_ref[...] = (logits - m - jnp.log(denom)).astype(o_ref.dtype)
    else:
        o_ref[...] = (e * pl.reciprocal(denom, approx=True)).astype(o_ref.dtype)
    # TODO(synk): training-mode dropout (pltpu.prng_random_bits mask) is not
    # implemented.


def attention_weights(l_feat, conv_w, conv_b, *, log=False, tile_n=None):
    """Pallas forward of AttentionWeights.

    l_feat: (N, k2, L) float32 or bfloat16
    conv_w: (1, k2, w3);  conv_b: (1,)
    returns (log_)softmax(conv1d(l_feat)).squeeze(1), shape (N, L - w3 + 1), f32.
    """
    n, c, l = l_feat.shape
    out_c, c_w, w3 = conv_w.shape
    assert out_c == 1 and c_w == c and 1 <= w3 <= l
    l_out = l - w3 + 1
    w_pad = _round_up(l, 128)        # lane-dense working width (>= L > l_out - 1)

    x = l_feat
    if w_pad != l:
        # Zero-pad the sequence up to a lane multiple; padded columns only ever
        # feed masked output lanes.  (No-op when L is already a 128 multiple.)
        x = jnp.pad(x, ((0, 0), (0, 0), (0, w_pad - l)))
    # Free (metadata-only) reshape: batch*channel rows on sublanes, seq on lanes.
    x2 = x.reshape(n * c, w_pad)

    if tile_n is None:
        tile_n = _pick_tile_n(n, c, w_pad, x2.dtype.itemsize)
    assert n % tile_n == 0 and (tile_n % 8 == 0 or tile_n == n), tile_n
    grid = (n // tile_n,)

    w2d = conv_w.reshape(c, w3).astype(jnp.float32)    # SMEM scalar taps
    b2d = conv_b.reshape(1, 1).astype(jnp.float32)     # SMEM scalar bias

    kernel = functools.partial(
        _attn_weights_kernel, w3=w3, c_in=c, l_out=l_out, log=log)

    cost = pl.CostEstimate(
        flops=2 * n * c * w3 * w_pad + 6 * n * w_pad,
        transcendentals=n * w_pad + n,
        bytes_accessed=n * c * w_pad * x2.dtype.itemsize + n * w_pad * 4,
    )

    out = pl.pallas_call(
        kernel,
        out_shape=jax.ShapeDtypeStruct((n, w_pad), jnp.float32),
        grid=grid,
        in_specs=[
            pl.BlockSpec((tile_n * c, w_pad), lambda i: (i, 0)),
            pl.BlockSpec(memory_space=pltpu.MemorySpace.SMEM),
            pl.BlockSpec(memory_space=pltpu.MemorySpace.SMEM),
        ],
        out_specs=pl.BlockSpec((tile_n, w_pad), lambda i: (i, 0)),
        compiler_params=pltpu.CompilerParams(
            dimension_semantics=("parallel",),      # batch tiles are independent
            vmem_limit_bytes=32 * 1024 * 1024,
        ),
        cost_estimate=cost,
    )(x2, w2d, b2d)
    return out[:, :l_out]


def reference(l_feat, conv_w, conv_b, *, log=False):
    """Pure-JAX reference matching PyTorch Conv1d + (log_)softmax semantics (f32)."""
    n, c, l = l_feat.shape
    w3 = conv_w.shape[-1]
    l_out = l - w3 + 1
    x = l_feat.astype(jnp.float32)
    w = conv_w.astype(jnp.float32)
    out = jnp.full((n, l_out), conv_b[0].astype(jnp.float32))
    for k in range(w3):
        out = out + jnp.sum(x[:, :, k:k + l_out] * w[0, :, k][None, :, None], axis=1)
    if log:
        return jax.nn.log_softmax(out, axis=1)
    return jax.nn.softmax(out, axis=1)


def _check(name, l_feat, conv_w, conv_b, log=False, tile_n=None):
    out = jax.block_until_ready(
        attention_weights(l_feat, conv_w, conv_b, log=log, tile_n=tile_n))
    ref = reference(l_feat, conv_w, conv_b, log=log)
    assert out.shape == ref.shape, (name, out.shape, ref.shape)
    if log:
        assert jnp.allclose(out, ref, atol=1e-4, rtol=1e-4), (
            name, float(jnp.max(jnp.abs(out - ref))))
        return out
    # Normalization uses the EUP's approximate reciprocal -> rows sum to 1 only
    # up to that approximation.
    row_sum = jnp.sum(out, axis=1)
    assert jnp.allclose(row_sum, 1.0, atol=5e-3), (name, row_sum)
    # Cancel the approximate-reciprocal factor and check the distribution tightly.
    out_exact = out / row_sum[:, None]
    assert jnp.allclose(out_exact, ref, atol=1e-4, rtol=1e-4), (
        name, float(jnp.max(jnp.abs(out_exact - ref))))
    return out


if __name__ == "__main__":
    key = jax.random.PRNGKey(0)

    # Small shape consistent with the module: batch=2, k2=4 channels, L=16, w3=3.
    N, K2, L, W3 = 2, 4, 16, 3
    key, k_x, k_w, k_b = jax.random.split(key, 4)
    bound = 1.0 / (K2 * W3) ** 0.5          # PyTorch Conv1d default init range
    l_feat = jax.random.normal(k_x, (N, K2, L), dtype=jnp.float32)
    conv_w = jax.random.uniform(k_w, (1, K2, W3), jnp.float32, -bound, bound)
    conv_b = jax.random.uniform(k_b, (1,), jnp.float32, -bound, bound)
    out = _check("f32_small", l_feat, conv_w, conv_b)
    assert out.shape == (N, L - W3 + 1)
    _check("f32_small_log", l_feat, conv_w, conv_b, log=True)

    # Slightly larger bf16 case exercising the batch grid (2 parallel blocks),
    # sequence padding/masking and the half-width input DMA path.
    N2, C2, L2, K3 = 16, 4, 200, 5
    key, k_x, k_w, k_b = jax.random.split(key, 4)
    bound = 1.0 / (C2 * K3) ** 0.5
    l_feat2 = jax.random.normal(k_x, (N2, C2, L2), jnp.float32).astype(jnp.bfloat16)
    conv_w2 = jax.random.uniform(k_w, (1, C2, K3), jnp.float32, -bound, bound)
    conv_b2 = jax.random.uniform(k_b, (1,), jnp.float32, -bound, bound)
    _check("bf16_tiled", l_feat2, conv_w2, conv_b2, tile_n=8)

    print("KERNEL_OK")
</pallas_src>

<mosaic_0001>
module attributes {stable_mosaic.version = 11 : i64} {
  func.func @_attn_weights_kernel(%arg0: i32, %arg1: memref<8x128xf32, #tpu.memory_space<vmem>>, %arg2: memref<4x3xf32, #tpu.memory_space<smem>>, %arg3: memref<1x1xf32, #tpu.memory_space<smem>>, %arg4: memref<2x128xf32, #tpu.memory_space<vmem>>) attributes {dimension_semantics = [#tpu.dimension_semantics<parallel>], iteration_bounds = array<i64: 1>, scalar_prefetch = 0 : i64, scratch_operands = 0 : i64, tpu.core_type = #tpu.core_type<tc>, window_params = [{transform_indices = @transform_0, window_bounds = array<i64: 8, 128>}, {transform_indices = @transform_1, window_bounds = array<i64: 4, 3>}, {transform_indices = @transform_2, window_bounds = array<i64: 1, 1>}, {transform_indices = @transform_3, window_bounds = array<i64: 2, 128>}]} {
    %cst = arith.constant 0.000000e+00 : f32
    %0 = vector.broadcast %cst : f32 to vector<2x128xf32>
    %c0 = arith.constant 0 : index
    %c0_0 = arith.constant 0 : index
    %1 = tpu.strided_load %arg1[%c0, %c0_0] {strides = array<i32: 4, 1>} : memref<8x128xf32, #tpu.memory_space<vmem>>, vector<2x128xf32>
    %c0_1 = arith.constant 0 : index
    %c0_2 = arith.constant 0 : index
    %2 = memref.load %arg2[%c0_1, %c0_2] : memref<4x3xf32, #tpu.memory_space<smem>>
    %3 = vector.broadcast %2 : f32 to vector<2x128xf32>
    %4 = arith.mulf %1, %3 : vector<2x128xf32>
    %5 = arith.addf %0, %4 : vector<2x128xf32>
    %c127_i32 = arith.constant 127 : i32
    %6 = tpu.dynamic_rotate %1 by %c127_i32 dim 1 : vector<2x128xf32>, i32 -> vector<2x128xf32>
    %c0_3 = arith.constant 0 : index
    %c1 = arith.constant 1 : index
    %7 = memref.load %arg2[%c0_3, %c1] : memref<4x3xf32, #tpu.memory_space<smem>>
    %8 = vector.broadcast %7 : f32 to vector<2x128xf32>
    %9 = arith.mulf %6, %8 : vector<2x128xf32>
    %10 = arith.addf %5, %9 : vector<2x128xf32>
    %c126_i32 = arith.constant 126 : i32
    %11 = tpu.dynamic_rotate %1 by %c126_i32 dim 1 : vector<2x128xf32>, i32 -> vector<2x128xf32>
    %c0_4 = arith.constant 0 : index
    %c2 = arith.constant 2 : index
    %12 = memref.load %arg2[%c0_4, %c2] : memref<4x3xf32, #tpu.memory_space<smem>>
    %13 = vector.broadcast %12 : f32 to vector<2x128xf32>
    %14 = arith.mulf %11, %13 : vector<2x128xf32>
    %15 = arith.addf %10, %14 : vector<2x128xf32>
    %c1_5 = arith.constant 1 : index
    %c0_6 = arith.constant 0 : index
    %16 = tpu.strided_load %arg1[%c1_5, %c0_6] {strides = array<i32: 4, 1>} : memref<8x128xf32, #tpu.memory_space<vmem>>, vector<2x128xf32>
    %c1_7 = arith.constant 1 : index
    %c0_8 = arith.constant 0 : index
    %17 = memref.load %arg2[%c1_7, %c0_8] : memref<4x3xf32, #tpu.memory_space<smem>>
    %18 = vector.broadcast %17 : f32 to vector<2x128xf32>
    %19 = arith.mulf %16, %18 : vector<2x128xf32>
    %20 = arith.addf %15, %19 : vector<2x128xf32>
    %c127_i32_9 = arith.constant 127 : i32
    %21 = tpu.dynamic_rotate %16 by %c127_i32_9 dim 1 : vector<2x128xf32>, i32 -> vector<2x128xf32>
    %c1_10 = arith.constant 1 : index
    %c1_11 = arith.constant 1 : index
    %22 = memref.load %arg2[%c1_10, %c1_11] : memref<4x3xf32, #tpu.memory_space<smem>>
    %23 = vector.broadcast %22 : f32 to vector<2x128xf32>
    %24 = arith.mulf %21, %23 : vector<2x128xf32>
    %25 = arith.addf %20, %24 : vector<2x128xf32>
    %c126_i32_12 = arith.constant 126 : i32
    %26 = tpu.dynamic_rotate %16 by %c126_i32_12 dim 1 : vector<2x128xf32>, i32 -> vector<2x128xf32>
    %c1_13 = arith.constant 1 : index
    %c2_14 = arith.constant 2 : index
    %27 = memref.load %arg2[%c1_13, %c2_14] : memref<4x3xf32, #tpu.memory_space<smem>>
    %28 = vector.broadcast %27 : f32 to vector<2x128xf32>
    %29 = arith.mulf %26, %28 : vector<2x128xf32>
    %30 = arith.addf %25, %29 : vector<2x128xf32>
    %c2_15 = arith.constant 2 : index
    %c0_16 = arith.constant 0 : index
    %31 = tpu.strided_load %arg1[%c2_15, %c0_16] {strides = array<i32: 4, 1>} : memref<8x128xf32, #tpu.memory_space<vmem>>, vector<2x128xf32>
    %c2_17 = arith.constant 2 : index
    %c0_18 = arith.constant 0 : index
    %32 = memref.load %arg2[%c2_17, %c0_18] : memref<4x3xf32, #tpu.memory_space<smem>>
    %33 = vector.broadcast %32 : f32 to vector<2x128xf32>
    %34 = arith.mulf %31, %33 : vector<2x128xf32>
    %35 = arith.addf %30, %34 : vector<2x128xf32>
    %c127_i32_19 = arith.constant 127 : i32
    %36 = tpu.dynamic_rotate %31 by %c127_i32_19 dim 1 : vector<2x128xf32>, i32 -> vector<2x128xf32>
    %c2_20 = arith.constant 2 : index
    %c1_21 = arith.constant 1 : index
    %37 = memref.load %arg2[%c2_20, %c1_21] : memref<4x3xf32, #tpu.memory_space<smem>>
    %38 = vector.broadcast %37 : f32 to vector<2x128xf32>
    %39 = arith.mulf %36, %38 : vector<2x128xf32>
    %40 = arith.addf %35, %39 : vector<2x128xf32>
    %c126_i32_22 = arith.constant 126 : i32
    %41 = tpu.dynamic_rotate %31 by %c126_i32_22 dim 1 : vector<2x128xf32>, i32 -> vector<2x128xf32>
    %c2_23 = arith.constant 2 : index
    %c2_24 = arith.constant 2 : index
    %42 = memref.load %arg2[%c2_23, %c2_24] : memref<4x3xf32, #tpu.memory_space<smem>>
    %43 = vector.broadcast %42 : f32 to vector<2x128xf32>
    %44 = arith.mulf %41, %43 : vector<2x128xf32>
    %45 = arith.addf %40, %44 : vector<2x128xf32>
    %c3 = arith.constant 3 : index
    %c0_25 = arith.constant 0 : index
    %46 = tpu.strided_load %arg1[%c3, %c0_25] {strides = array<i32: 4, 1>} : memref<8x128xf32, #tpu.memory_space<vmem>>, vector<2x128xf32>
    %c3_26 = arith.constant 3 : index
    %c0_27 = arith.constant 0 : index
    %47 = memref.load %arg2[%c3_26, %c0_27] : memref<4x3xf32, #tpu.memory_space<smem>>
    %48 = vector.broadcast %47 : f32 to vector<2x128xf32>
    %49 = arith.mulf %46, %48 : vector<2x128xf32>
    %50 = arith.addf %45, %49 : vector<2x128xf32>
    %c127_i32_28 = arith.constant 127 : i32
    %51 = tpu.dynamic_rotate %46 by %c127_i32_28 dim 1 : vector<2x128xf32>, i32 -> vector<2x128xf32>
    %c3_29 = arith.constant 3 : index
    %c1_30 = arith.constant 1 : index
    %52 = memref.load %arg2[%c3_29, %c1_30] : memref<4x3xf32, #tpu.memory_space<smem>>
    %53 = vector.broadcast %52 : f32 to vector<2x128xf32>
    %54 = arith.mulf %51, %53 : vector<2x128xf32>
    %55 = arith.addf %50, %54 : vector<2x128xf32>
    %c126_i32_31 = arith.constant 126 : i32
    %56 = tpu.dynamic_rotate %46 by %c126_i32_31 dim 1 : vector<2x128xf32>, i32 -> vector<2x128xf32>
    %c3_32 = arith.constant 3 : index
    %c2_33 = arith.constant 2 : index
    %57 = memref.load %arg2[%c3_32, %c2_33] : memref<4x3xf32, #tpu.memory_space<smem>>
    %58 = vector.broadcast %57 : f32 to vector<2x128xf32>
    %59 = arith.mulf %56, %58 : vector<2x128xf32>
    %60 = arith.addf %55, %59 : vector<2x128xf32>
    %c0_34 = arith.constant 0 : index
    %c0_35 = arith.constant 0 : index
    %61 = memref.load %arg3[%c0_34, %c0_35] : memref<1x1xf32, #tpu.memory_space<smem>>
    %62 = vector.broadcast %61 : f32 to vector<2x128xf32>
    %63 = arith.addf %60, %62 : vector<2x128xf32>
    %64 = tpu.iota {dimensions = array<i32: 1>} : vector<2x128xi32>
    %c14_i32 = arith.constant 14 : i32
    %65 = vector.broadcast %c14_i32 : i32 to vector<2x128xi32>
    %66 = arith.cmpi slt, %64, %65 : vector<2x128xi32>
    %cst_36 = arith.constant 0xFF800000 : f32
    %67 = vector.broadcast %cst_36 : f32 to vector<2x128xf32>
    %68 = arith.select %66, %63, %67 : vector<2x128xi1>, vector<2x128xf32>
    %cst_37 = arith.constant dense<0xFF800000> : vector<2xf32>
    %69 = vector.multi_reduction <maximumf>, %68, %cst_37 [1] : vector<2x128xf32> to vector<2xf32>
    %70 = vector.shape_cast %69 : vector<2xf32> to vector<2x1xf32>
    %71 = vector.broadcast %70 : vector<2x1xf32> to vector<2x128xf32>
    %72 = arith.subf %68, %71 : vector<2x128xf32>
    %73 = math.exp %72 : vector<2x128xf32>
    %cst_38 = arith.constant dense<0.000000e+00> : vector<2xf32>
    %74 = vector.multi_reduction <add>, %73, %cst_38 [1] : vector<2x128xf32> to vector<2xf32>
    %75 = vector.shape_cast %74 : vector<2xf32> to vector<2x1xf32>
    %76 = tpu.reciprocal %75 {approx = true} : vector<2x1xf32> -> vector<2x1xf32>
    %77 = vector.broadcast %76 : vector<2x1xf32> to vector<2x128xf32>
    %78 = arith.mulf %73, %77 : vector<2x128xf32>
    %c0_39 = arith.constant 0 : index
    %c0_40 = arith.constant 0 : index
    %79 = vector.load %arg4[%c0_39, %c0_40] : memref<2x128xf32, #tpu.memory_space<vmem>>, vector<2x128xf32>
    tpu.vector_store %arg4[%c0_39, %c0_40], %78 {strides = array<i32>} : memref<2x128xf32, #tpu.memory_space<vmem>>, vector<2x128xf32>,
    return
  }
  func.func @transform_0(%arg0: i32) -> (i32, i32) {
    %c0_i32 = arith.constant 0 : i32
    %c0_i32_0 = arith.constant 0 : i32
    return %arg0, %c0_i32 : i32, i32
  }
  func.func @transform_1(%arg0: i32) -> (i32, i32) {
    %c0_i32 = arith.constant 0 : i32
    %c0_i32_0 = arith.constant 0 : i32
    %c0_i32_1 = arith.constant 0 : i32
    return %c0_i32, %c0_i32_0 : i32, i32
  }
  func.func @transform_2(%arg0: i32) -> (i32, i32) {
    %c0_i32 = arith.constant 0 : i32
    %c0_i32_0 = arith.constant 0 : i32
    %c0_i32_1 = arith.constant 0 : i32
    return %c0_i32, %c0_i32_0 : i32, i32
  }
  func.func @transform_3(%arg0: i32) -> (i32, i32) {
    %c0_i32 = arith.constant 0 : i32
    %c0_i32_0 = arith.constant 0 : i32
    return %arg0, %c0_i32 : i32, i32
  }
}

</mosaic_0001>

<bundles_post_ra>
// kernel: tpu_custom_call.1
= control target key start
LH: loop header
LB: loop body
LE: loop exit
PB: predicated region body
PF: predicated region fallthrough
CT: control target
= control target key end

     0   :  { %9 = vsyncpa [#allocation4], 0  ;;  %s285_s0 = inlined_call_operand.hbm [shape: f32[8,128], index: 0, kind: input, shape index: {}]   ;;  %s286_s1 = inlined_call_operand.vmem [shape: f32[4,3], index: 1, kind: input, shape index: {}]   ;;  %s287_s2 = inlined_call_operand.<no memory space> [shape: f32[1,1], index: 2, kind: input, shape index: {}]   ;;  %s288_s3 = inlined_call_operand.hbm [shape: f32[2,128], index: 3, kind: output, shape index: {}]  }
   0x1   :  { %10 = vsyncpa [#allocation6], 0 }
   0x2   :  { %11 = vsyncpa [#allocation5], 0  ;;  %s28_s14 = sshll.u32 %s286_s1, 4  ;;  %s230_s15 = smov [#allocation3]   ;;  %s29_s14 = int_to_ptr.vmem [resolvable:$true] %s28_s14 }
   0x3   :  { %s18_s16 = sshll.u32 %s230_s15, 4  ;;  %s168_s19 = scalar_lea.hbm %s285_s0, 128  ;;  %s19_s16 = int_to_ptr.vmem [resolvable:$true] %s18_s16 }
   0x4   :  { %p169_p0 = scmp.ne.s32.totalorder %s285_s0, %s168_s19  ;;  %p172_p1 = scmp.lt.u32.totalorder %s168_s19, %s285_s0 }
   0x6   :  { %p174_p2 = pnand %p172_p1, %p169_p0 }
   0x8   :  { %177 = shalt.err (!%p174_p2)
}
   0x9   :  { %s178_s24 = scalar_lea.vmem %s19_s16, 128  ;;  %p183_p4 = scmp.lt.s32.totalorder %s19_s16, %s19_s16 }
   0xa   :  { %p179_p3 = scmp.ne.s32.totalorder %s19_s16, %s178_s24  ;;  %p184_p5 = scmp.lt.s32.totalorder %s178_s24, %s178_s24 }
   0xc   :  { %p185_p6 = por %p184_p5, %p183_p4 }
   0xe   :  { %p186_p7 = pnand %p185_p6, %p179_p3 }
  0x10   :  { %189 = shalt.err (!%p186_p7)
}
  0x11   :  { %21 = dma.hbm_to_vmem [thread:$0]  %s285_s0, 128, %s19_s16, [#allocation4]  }
  0x12   :  { %s190_s26 = scalar_lea.vmem %s29_s14, 64  ;;  %p195_p9 = scmp.lt.s32.totalorder %s29_s14, %s29_s14 }
  0x13   :  { %p191_p8 = scmp.ne.s32.totalorder %s29_s14, %s190_s26  ;;  %p196_p10 = scmp.lt.s32.totalorder %s190_s26, %s190_s26 }
  0x15   :  { %p197_p11 = por %p196_p10, %p195_p9 }
  0x17   :  { %p198_p12 = pnand %p197_p11, %p191_p8 }
  0x19   :  { %201 = shalt.err (!%p198_p12)
}
  0x1a   :  { %s231_s27 = smov [#allocation7]  }
  0x1b   :  { %31 = dma.vmem_to_smem %s29_s14, 64, %s231_s27, [#allocation6]  }
  0x1c   :  { %224 = dma.done.wait [#allocation4], 128  }
  0x1d   :  { %225 = vsyncadd [#allocation4], 4294967168 }
  0x1e   :  { %226 = dma.done.wait [#allocation6], 64  }
  0x1f   :  { %227 = vsyncadd [#allocation6], 4294967232 }
  0x20   :  { %40 = sfence }
  0x21   :  { %v41_v0 = vld [vmem:[#allocation3] ss:$4 sm:$0x3]  ;;  %s232_s28 = smov 127   ;;  %s233_s0 = smov 126   ;;  %v115_v41 = vlaneseq  ;;  %v113_v48 = vstv %s287_s2  ;;  %vm119_vm1 = vcmask 1041408  }
  0x22   :  { %46 = vrot.lane.b32.xlu0 %v41_v0, %s232_s28  ;;  %v59_v1 = vld [vmem:[#allocation3 + $0x1] ss:$4 sm:$0x3]  ;;  %v77_v2 = vld [vmem:[#allocation3 + $0x2] ss:$4 sm:$0x3] }
  0x23   :  { %64 = vrot.lane.b32.xlu1 %v59_v1, %s232_s28  ;;  %v95_v3 = vld [vmem:[#allocation3 + $0x3] ss:$4 sm:$0x3]  ;;  %s42_s29 = sld [smem:[#allocation7]]  ;;  %s148_s30 = sld [smem:[#allocation7 + $0x1]]  ;;  %v116_v46 = vand.u32 127, %v115_v41 }
  0x24   :  { %s150_s4 = sld [smem:[#allocation7 + $0x80]]  ;;  %s149_s5 = sld [smem:[#allocation7 + $0x2]] }
  0x25   :  { %s151_s6 = sld [smem:[#allocation7 + $0x81]]  ;;  %s152_s7 = sld [smem:[#allocation7 + $0x82]]  ;;  %vm117_vm0 = vcmp.lt.s32.totalorder %v116_v46, 14 }
  0x26   :  { %52 = vrot.lane.b32.xlu0 %v41_v0, %s233_s0  ;;  %s153_s8 = sld [smem:[#allocation7 + $0x100]]  ;;  %s154_s9 = sld [smem:[#allocation7 + $0x101]] }
  0x27   :  { %70 = vrot.lane.b32.xlu1 %v59_v1, %s233_s0  ;;  %s155_s10 = sld [smem:[#allocation7 + $0x102]]  ;;  %s156_s11 = sld [smem:[#allocation7 + $0x180]] }
  0x28   :  { %s157_s12 = sld [smem:[#allocation7 + $0x181]]  ;;  %s158_s13 = sld [smem:[#allocation7 + $0x182]] }
  0x29   :  { %v43_v4 = vstv %s42_s29  ;;  %v49_v5 = vstv %s148_s30  ;;  %s234_s16 = smov [#allocation8]  }
  0x2a   :  { %82 = vrot.lane.b32.xlu0 %v77_v2, %s232_s28  ;;  %v44_v7 = vmul.f32 %v43_v4, %v41_v0  ;;  %v61_v10 = vstv %s150_s4  ;;  %v55_v11 = vstv %s149_s5  ;;  %s138_s17 = sshll.u32 %s234_s16, 4  ;;  %s139_s17 = int_to_ptr.vmem [resolvable:$true] %s138_s17 }
  0x2b   :  { %88 = vrot.lane.b32.xlu1 %v77_v2, %s233_s0  ;;  %v62_v13 = vmul.f32 %v61_v10, %v59_v1  ;;  %v67_v16 = vstv %s151_s6  ;;  %v73_v17 = vstv %s152_s7  ;;  %s202_s2 = scalar_lea.vmem %s139_s17, 32  ;;  %p207_p0 = scmp.lt.s32.totalorder %s139_s17, %s139_s17 }
  0x2c   :  { %v79_v20 = vstv %s153_s8  ;;  %v85_v24 = vstv %s154_s9  ;;  %p203_p13 = scmp.ne.s32.totalorder %s139_s17, %s202_s2  ;;  %p208_p1 = scmp.lt.s32.totalorder %s202_s2, %s202_s2 }
  0x2d   :  { %v80_v26 = vmul.f32 %v79_v20, %v77_v2  ;;  %v91_v28 = vstv %s155_s10  ;;  %v97_v32 = vstv %s156_s11 }
  0x2e   :  { %100 = vrot.lane.b32.xlu0 %v95_v3, %s232_s28  ;;  %v103_v35 = vstv %s157_s12  ;;  %v98_v37 = vmul.f32 %v97_v32, %v95_v3  ;;  %v109_v39 = vstv %s158_s13  ;;  %p209_p2 = por %p208_p1, %p207_p0 }
  0x2f   :  { %106 = vrot.lane.b32.xlu1 %v95_v3, %s233_s0 }
  0x30   :  { %p210_p3 = pnand %p209_p2, %p203_p13 }
  0x94   :  { %v47_v6 = vpop.permute.xlu0 %46 }
  0x95   :  { %v50_v8 = vmul.f32 %v49_v5, %v47_v6  ;;  %v65_v9 = vpop.permute.xlu1 %64 }
  0x96   :  { %v68_v22 = vmul.f32 %v67_v16, %v65_v9 }
  0x97   :  { %v51_v14 = vadd.f32 %v50_v8, %v44_v7 }
  0x98   :  { %v53_v12 = vpop.permute.xlu0 %52 }
  0x99   :  { %v56_v15 = vmul.f32 %v55_v11, %v53_v12  ;;  %v71_v18 = vpop.permute.xlu1 %70 }
  0x9a   :  { %v74_v23 = vmul.f32 %v73_v17, %v71_v18 }
  0x9b   :  { %v57_v19 = vadd.f32 %v56_v15, %v51_v14 }
  0x9c   :  { %v83_v25 = vpop.permute.xlu0 %82 }
  0x9d   :  { %v63_v21 = vadd.f32 %v62_v13, %v57_v19  ;;  %v89_v29 = vpop.permute.xlu1 %88  ;;  %v86_v31 = vmul.f32 %v85_v24, %v83_v25 }
  0x9e   :  { %v92_v34 = vmul.f32 %v91_v28, %v89_v29 }
  0x9f   :  { %v69_v27 = vadd.f32 %v68_v22, %v63_v21 }
  0xa0   :  { %v101_v36 = vpop.permute.xlu0 %100 }
  0xa1   :  { %v75_v30 = vadd.f32 %v74_v23, %v69_v27  ;;  %v107_v40 = vpop.permute.xlu1 %106  ;;  %v104_v43 = vmul.f32 %v103_v35, %v101_v36 }
  0xa2   :  { %v110_v45 = vmul.f32 %v109_v39, %v107_v40 }
  0xa3   :  { %v81_v33 = vadd.f32 %v80_v26, %v75_v30 }
  0xa5   :  { %v87_v38 = vadd.f32 %v86_v31, %v81_v33 }
  0xa7   :  { %v93_v42 = vadd.f32 %v92_v34, %v87_v38 }
  0xa9   :  { %v99_v44 = vadd.f32 %v98_v37, %v93_v42 }
  0xab   :  { %v105_v47 = vadd.f32 %v104_v43, %v99_v44 }
  0xad   :  { %v111_v49 = vadd.f32 %v110_v45, %v105_v47 }
  0xaf   :  { %v114_v50 = vadd.f32 %v113_v48, %v111_v49 }
  0xb1   :  { %v118_v51 = vsel %vm117_vm0, %v114_v50, -inf }
  0xb2   :  { %v120_v52 = vsel %vm119_vm1, %v118_v51, -inf }
  0xb3   :  { %121 = vmax.xlane.f32.xlu0 %v120_v52 }
 0x140   :  { %v122_v53 = vpop.xlane.xlu0 %121 }
 0x141   :  { %v123_v54 = vsub.f32 %v118_v51, %v122_v53 }
 0x143   :  { %v124_v55 = vmul.f32 1.442695, %v123_v54 }
 0x145   :  { %164 = vpow2.f32 %v124_v55 }
 0x14f   :  { %v165_v56 = vpop.eup %164 }
 0x150   :  { %v126_v57 = vsel %vm119_vm1, %v165_v56, 0.0 }
 0x151   :  { %127 = vadd.xlane.f32.xlu1 %v126_v57 }
 0x1de   :  { %v128_v58 = vpop.xlane.xlu1 %127 }
 0x1df   :  { %166 = vrcp.f32 %v128_v58 }
 0x1e9   :  { %v167_v59 = vpop.eup %166 }
 0x1ea   :  { %v130_v60 = vmul.f32 %v167_v59, %v165_v56 }
 0x1ec   :  { %131 = vst [vmem:[#allocation8] sm:$0x3] %v130_v60 }
 0x1ed   :  { %213 = shalt.err (!%p210_p3)
}
 0x1ee   :  { %s214_s20 = scalar_lea.hbm %s288_s3, 32 }
 0x1ef   :  { %p215_p4 = scmp.ne.s32.totalorder %s288_s3, %s214_s20  ;;  %p218_p5 = scmp.lt.u32.totalorder %s214_s20, %s288_s3 }
 0x1f1   :  { %p220_p6 = pnand %p218_p5, %p215_p4 }
 0x1f3   :  { %223 = shalt.err (!%p220_p6)
}
 0x1f4   :  { %141 = dma.vmem_to_hbm [thread:$0]  %s139_s17, 32, %s288_s3, [#allocation5]  }
 0x1f5   :  { %228 = dma.done.wait [#allocation5], 32  }
 0x1f6   :  { %229 = vsyncadd [#allocation5], 4294967264 }
 0x1f7   :  { %145 = vsyncpa [#allocation4], 1 }
 0x1f8   :  { %146 = vsyncpa [#allocation5], 1 }
 0x1f9   :  { %147 = vsyncpa [#allocation6], 1 }

</bundles_post_ra>
